<compile_context>
chip_gen: v7x
topology: tpu7x:2x2x1
jax: 0.10.0
libtpu: 0.0.40
codegen_flags: <defaults>
</compile_context>

<pallas_src>
import jax
import jax.numpy as jnp
from jax.experimental import pallas as pl
from jax.experimental.pallas import tpu as pltpu

LANE = 128


def _round_up(x, m):
    return ((x + m - 1) // m) * m


def _align_tile(t):
    return max(LANE, (t // LANE) * LANE)


def _vmem_limit_bytes(estimate):
    # Headroom for compiler-internal scratch; cap well below v7x's 64 MiB
    # physical per-TC VMEM (48 MiB is safe on every generation).
    return int(min(max(estimate + (4 << 20), 16 << 20), 48 << 20))


# ----------------------------------------------------------------------------
# Kernel 1: fused MLP  (linear1 -> relu -> hidden linear -> relu -> linear2)
# Grid iterates over row-tiles of X; padded weights stay VMEM-resident.
# Dropout layers are identity in eval mode.  Z is stored in bf16 so the
# propagation pass streams half the bytes.
# ----------------------------------------------------------------------------
def mlp_kernel(x_ref, w1_ref, b1_ref, wh_ref, bh_ref, w2_ref, b2_ref, o_ref):
    x = x_ref[...]                                                   # (tm, fpad)
    h = jnp.dot(x, w1_ref[...], preferred_element_type=jnp.float32)  # (tm, hpad)
    h = jnp.maximum(h + b1_ref[...], 0.0)
    # TODO(synk): dropout is a no-op in eval mode; training-mode dropout would
    # need pltpu.prng_seed + pltpu.stateful_bernoulli.
    h = jnp.dot(h, wh_ref[...], preferred_element_type=jnp.float32)  # (tm, hpad)
    h = jnp.maximum(h + bh_ref[...], 0.0)
    z = jnp.dot(h, w2_ref[...], preferred_element_type=jnp.float32)  # (tm, cpad)
    o_ref[...] = (z + b2_ref[...]).astype(o_ref.dtype)               # bf16 store


# ----------------------------------------------------------------------------
# Kernel 2: dense PPR propagation  out = Pi @ Z, K-tiled.
# The f32 output block is resident across k (its index_map ignores k), so we
# accumulate in place — no scratch, no flush copy.
# ----------------------------------------------------------------------------
def prop_kernel(pi_ref, z_ref, o_ref):
    @pl.when(pl.program_id(1) == 0)
    def _():
        o_ref[...] = jnp.zeros_like(o_ref)

    o_ref[...] += jnp.dot(pi_ref[...], z_ref[...],
                          preferred_element_type=jnp.float32)


def _ppnpx_forward(X, Pi, params, *, max_tile=1024, tk_max=2048):
    """X: [N, nfeat] f32, Pi: [N, N] f32, params: PyTorch-convention weights
    (W: [out, in], b: [out]). Returns [N, nclass] f32."""
    N, nfeat = X.shape
    nhid = params["w1"].shape[0]
    nclass = params["w2"].shape[0]
    f32 = jnp.float32
    bf16 = jnp.bfloat16

    # Lane-pad every contraction/output dim; zero padding keeps math exact
    # (padded Pi columns are zero, so bias-propagated padded Z rows cancel).
    fpad = _round_up(nfeat, LANE)
    hpad = _round_up(nhid, LANE)
    cpad = _round_up(nclass, LANE)

    # Row tile: as large as allowed, but guarantee >= 2 row tiles whenever
    # N > LANE so v7x's two TensorCores both get work on the 'parallel' axis.
    max_tile = _align_tile(max_tile)
    tk_max = _align_tile(tk_max)
    tm = max(LANE, min(max_tile, _round_up((N + 1) // 2, LANE)))
    Npad = _round_up(N, tm)

    # K tile for propagation: largest multiple of tm that divides Npad and
    # stays <= tk_max (amortizes per-step overhead and Z re-fetch traffic).
    kk = Npad // tm
    g = 1
    for cand in range(kk, 0, -1):
        if kk % cand == 0 and tm * cand <= tk_max:
            g = cand
            break
    tk = tm * g

    # Pre-transpose weights to [in, out]; zero-pad; biases as (1, out). f32.
    w1t = jnp.zeros((fpad, hpad), f32).at[:nfeat, :nhid].set(params["w1"].T)
    b1 = jnp.zeros((1, hpad), f32).at[:, :nhid].set(params["b1"])
    wht = jnp.zeros((hpad, hpad), f32).at[:nhid, :nhid].set(params["wh"].T)
    bh = jnp.zeros((1, hpad), f32).at[:, :nhid].set(params["bh"])
    w2t = jnp.zeros((hpad, cpad), f32).at[:nhid, :nclass].set(params["w2"].T)
    b2 = jnp.zeros((1, cpad), f32).at[:, :nclass].set(params["b2"])

    # X: zero-pad rows to Npad and features to fpad (one fused pad under jit).
    Xp = jnp.pad(X.astype(f32), ((0, Npad - N), (0, fpad - nfeat)))

    # Pi: fused bf16 downcast + zero-pad (single pass over the N^2 matrix;
    # bf16 halves the HBM traffic of the dominant Pi @ Z stream).
    Pib = Pi.astype(bf16)
    if Npad != N:
        Pib = jnp.pad(Pib, ((0, Npad - N), (0, Npad - N)))

    full = lambda shape: pl.BlockSpec(shape, lambda i: (0, 0))

    # --- MLP over row tiles of X; Z emitted bf16, lane-dense (Npad x cpad) ---
    mlp_bytes = (4 * (2 * tm * fpad
                      + 2 * (fpad * hpad + hpad * hpad + hpad * cpad
                             + 2 * hpad + cpad))
                 + 2 * 2 * tm * cpad)
    Z = pl.pallas_call(
        mlp_kernel,
        out_shape=jax.ShapeDtypeStruct((Npad, cpad), bf16),
        grid=(Npad // tm,),
        in_specs=[
            pl.BlockSpec((tm, fpad), lambda i: (i, 0)),
            full((fpad, hpad)),
            full((1, hpad)),
            full((hpad, hpad)),
            full((1, hpad)),
            full((hpad, cpad)),
            full((1, cpad)),
        ],
        out_specs=pl.BlockSpec((tm, cpad), lambda i: (i, 0)),
        compiler_params=pltpu.CompilerParams(
            dimension_semantics=("parallel",),
            vmem_limit_bytes=_vmem_limit_bytes(mlp_bytes)),
    )(Xp, w1t, b1, wht, bh, w2t, b2)

    # --- Propagation out = Pi @ Z (bf16 operands, in-place f32 accumulation) --
    prop_bytes = 2 * (2 * tm * tk + 2 * tk * cpad) + 4 * 2 * tm * cpad
    out = pl.pallas_call(
        prop_kernel,
        out_shape=jax.ShapeDtypeStruct((Npad, cpad), f32),
        grid=(Npad // tm, Npad // tk),
        in_specs=[
            pl.BlockSpec((tm, tk), lambda i, k: (i, k)),
            pl.BlockSpec((tk, cpad), lambda i, k: (k, 0)),
        ],
        out_specs=pl.BlockSpec((tm, cpad), lambda i, k: (i, 0)),
        compiler_params=pltpu.CompilerParams(
            dimension_semantics=("parallel", "arbitrary"),
            vmem_limit_bytes=_vmem_limit_bytes(prop_bytes)),
    )(Pib, Z)

    return out[:N, :nclass]


# jit so wrapper-side pad/cast fuse into single passes and dispatch once.
ppnpx_forward = jax.jit(_ppnpx_forward, static_argnames=("max_tile", "tk_max"))


def ppnpx_reference(X, Pi, params):
    h = jnp.maximum(X @ params["w1"].T + params["b1"], 0.0)
    h = jnp.maximum(h @ params["wh"].T + params["bh"], 0.0)
    z = h @ params["w2"].T + params["b2"]
    return Pi @ z


if __name__ == "__main__":
    # Small shapes consistent with the module: N nodes, nfeat features,
    # nhid hidden units, nclass classes, nlayer=3 (one hidden linear).
    # max_tile=tk_max=128 so the demo exercises multi-step row + K grids.
    N, nfeat, nhid, nclass = 256, 32, 64, 16

    key = jax.random.PRNGKey(0)
    k = jax.random.split(key, 8)

    X = jax.random.normal(k[0], (N, nfeat), dtype=jnp.float32)

    # Row-stochastic-ish dense PPR matrix Pi.
    Pi_raw = jax.random.uniform(k[1], (N, N), dtype=jnp.float32)
    Pi = Pi_raw / jnp.sum(Pi_raw, axis=-1, keepdims=True)

    # Deterministic parameter init (PyTorch Linear convention: W [out, in]).
    def init_linear(kw, kb, fan_in, fan_out):
        bound = 1.0 / (fan_in ** 0.5)
        w = jax.random.uniform(kw, (fan_out, fan_in), jnp.float32, -bound, bound)
        b = jax.random.uniform(kb, (fan_out,), jnp.float32, -bound, bound)
        return w, b

    w1, b1 = init_linear(k[2], k[3], nfeat, nhid)
    wh, bh = init_linear(k[4], k[5], nhid, nhid)
    w2, b2 = init_linear(k[6], k[7], nhid, nclass)
    params = dict(w1=w1, b1=b1, wh=wh, bh=bh, w2=w2, b2=b2)

    out = ppnpx_forward(X, Pi, params, max_tile=128, tk_max=128)
    out = jax.block_until_ready(out)

    ref = ppnpx_reference(X, Pi, params)
    assert out.shape == (N, nclass)
    # Pi/Z are bf16 operands (f32 accumulation), so tolerance is loosened vs
    # the all-f32 reference.
    assert jnp.allclose(out, ref, atol=1e-2, rtol=1e-2), "mismatch vs reference"

    print("KERNEL_OK")
</pallas_src>

<mosaic_0001>
module attributes {stable_mosaic.version = 11 : i64} {
  func.func @mlp_kernel(%arg0: i32, %arg1: memref<128x128xf32, #tpu.memory_space<vmem>>, %arg2: memref<128x128xf32, #tpu.memory_space<vmem>>, %arg3: memref<1x128xf32, #tpu.memory_space<vmem>>, %arg4: memref<128x128xf32, #tpu.memory_space<vmem>>, %arg5: memref<1x128xf32, #tpu.memory_space<vmem>>, %arg6: memref<128x128xf32, #tpu.memory_space<vmem>>, %arg7: memref<1x128xf32, #tpu.memory_space<vmem>>, %arg8: memref<128x128xbf16, #tpu.memory_space<vmem>>) attributes {dimension_semantics = [#tpu.dimension_semantics<parallel>], iteration_bounds = array<i64: 2>, scalar_prefetch = 0 : i64, scratch_operands = 0 : i64, tpu.core_type = #tpu.core_type<tc>, window_params = [{transform_indices = @transform_0, window_bounds = array<i64: 128, 128>}, {pipeline_mode = #tpu.pipeline_mode<synchronous>, transform_indices = @transform_1, window_bounds = array<i64: 128, 128>}, {pipeline_mode = #tpu.pipeline_mode<synchronous>, transform_indices = @transform_2, window_bounds = array<i64: 1, 128>}, {pipeline_mode = #tpu.pipeline_mode<synchronous>, transform_indices = @transform_3, window_bounds = array<i64: 128, 128>}, {pipeline_mode = #tpu.pipeline_mode<synchronous>, transform_indices = @transform_4, window_bounds = array<i64: 1, 128>}, {pipeline_mode = #tpu.pipeline_mode<synchronous>, transform_indices = @transform_5, window_bounds = array<i64: 128, 128>}, {pipeline_mode = #tpu.pipeline_mode<synchronous>, transform_indices = @transform_6, window_bounds = array<i64: 1, 128>}, {transform_indices = @transform_7, window_bounds = array<i64: 128, 128>}]} {
    %c0 = arith.constant 0 : index
    %c0_0 = arith.constant 0 : index
    %0 = vector.load %arg1[%c0, %c0_0] : memref<128x128xf32, #tpu.memory_space<vmem>>, vector<128x128xf32>
    %c0_1 = arith.constant 0 : index
    %c0_2 = arith.constant 0 : index
    %1 = vector.load %arg2[%c0_1, %c0_2] : memref<128x128xf32, #tpu.memory_space<vmem>>, vector<128x128xf32>
    %cst = arith.constant dense<0.000000e+00> : vector<128x128xf32>
    %2 = tpu.matmul %0, %1, %cst {dimension_numbers = #tpu.dot_dimension_numbers<[1], [0], [0], [1], [0, 0, 1, 1], [], []>} : vector<128x128xf32>, vector<128x128xf32>, vector<128x128xf32> -> vector<128x128xf32>
    %c0_3 = arith.constant 0 : index
    %c0_4 = arith.constant 0 : index
    %3 = vector.load %arg3[%c0_3, %c0_4] : memref<1x128xf32, #tpu.memory_space<vmem>>, vector<1x128xf32>
    %4 = vector.broadcast %3 : vector<1x128xf32> to vector<128x128xf32>
    %5 = arith.addf %2, %4 : vector<128x128xf32>
    %cst_5 = arith.constant 0.000000e+00 : f32
    %6 = vector.broadcast %cst_5 : f32 to vector<128x128xf32>
    %7 = arith.maximumf %5, %6 : vector<128x128xf32>
    %c0_6 = arith.constant 0 : index
    %c0_7 = arith.constant 0 : index
    %8 = vector.load %arg4[%c0_6, %c0_7] : memref<128x128xf32, #tpu.memory_space<vmem>>, vector<128x128xf32>
    %cst_8 = arith.constant dense<0.000000e+00> : vector<128x128xf32>
    %9 = tpu.matmul %7, %8, %cst_8 {dimension_numbers = #tpu.dot_dimension_numbers<[1], [0], [0], [1], [0, 0, 1, 1], [], []>} : vector<128x128xf32>, vector<128x128xf32>, vector<128x128xf32> -> vector<128x128xf32>
    %c0_9 = arith.constant 0 : index
    %c0_10 = arith.constant 0 : index
    %10 = vector.load %arg5[%c0_9, %c0_10] : memref<1x128xf32, #tpu.memory_space<vmem>>, vector<1x128xf32>
    %11 = vector.broadcast %10 : vector<1x128xf32> to vector<128x128xf32>
    %12 = arith.addf %9, %11 : vector<128x128xf32>
    %cst_11 = arith.constant 0.000000e+00 : f32
    %13 = vector.broadcast %cst_11 : f32 to vector<128x128xf32>
    %14 = arith.maximumf %12, %13 : vector<128x128xf32>
    %c0_12 = arith.constant 0 : index
    %c0_13 = arith.constant 0 : index
    %15 = vector.load %arg6[%c0_12, %c0_13] : memref<128x128xf32, #tpu.memory_space<vmem>>, vector<128x128xf32>
    %cst_14 = arith.constant dense<0.000000e+00> : vector<128x128xf32>
    %16 = tpu.matmul %14, %15, %cst_14 {dimension_numbers = #tpu.dot_dimension_numbers<[1], [0], [0], [1], [0, 0, 1, 1], [], []>} : vector<128x128xf32>, vector<128x128xf32>, vector<128x128xf32> -> vector<128x128xf32>
    %c0_15 = arith.constant 0 : index
    %c0_16 = arith.constant 0 : index
    %17 = vector.load %arg7[%c0_15, %c0_16] : memref<1x128xf32, #tpu.memory_space<vmem>>, vector<1x128xf32>
    %18 = vector.broadcast %17 : vector<1x128xf32> to vector<128x128xf32>
    %19 = arith.addf %16, %18 : vector<128x128xf32>
    %20 = arith.truncf %19 : vector<128x128xf32> to vector<128x128xbf16>
    %c0_17 = arith.constant 0 : index
    %c0_18 = arith.constant 0 : index
    %21 = vector.load %arg8[%c0_17, %c0_18] : memref<128x128xbf16, #tpu.memory_space<vmem>>, vector<128x128xbf16>
    tpu.vector_store %arg8[%c0_17, %c0_18], %20 {strides = array<i32>} : memref<128x128xbf16, #tpu.memory_space<vmem>>, vector<128x128xbf16>,
    return
  }
  func.func @transform_0(%arg0: i32) -> (i32, i32) {
    %c0_i32 = arith.constant 0 : i32
    %c0_i32_0 = arith.constant 0 : i32
    return %arg0, %c0_i32 : i32, i32
  }
  func.func @transform_1(%arg0: i32) -> (i32, i32) {
    %c0_i32 = arith.constant 0 : i32
    %c0_i32_0 = arith.constant 0 : i32
    %c0_i32_1 = arith.constant 0 : i32
    return %c0_i32, %c0_i32_0 : i32, i32
  }
  func.func @transform_2(%arg0: i32) -> (i32, i32) {
    %c0_i32 = arith.constant 0 : i32
    %c0_i32_0 = arith.constant 0 : i32
    %c0_i32_1 = arith.constant 0 : i32
    return %c0_i32, %c0_i32_0 : i32, i32
  }
  func.func @transform_3(%arg0: i32) -> (i32, i32) {
    %c0_i32 = arith.constant 0 : i32
    %c0_i32_0 = arith.constant 0 : i32
    %c0_i32_1 = arith.constant 0 : i32
    return %c0_i32, %c0_i32_0 : i32, i32
  }
  func.func @transform_4(%arg0: i32) -> (i32, i32) {
    %c0_i32 = arith.constant 0 : i32
    %c0_i32_0 = arith.constant 0 : i32
    %c0_i32_1 = arith.constant 0 : i32
    return %c0_i32, %c0_i32_0 : i32, i32
  }
  func.func @transform_5(%arg0: i32) -> (i32, i32) {
    %c0_i32 = arith.constant 0 : i32
    %c0_i32_0 = arith.constant 0 : i32
    %c0_i32_1 = arith.constant 0 : i32
    return %c0_i32, %c0_i32_0 : i32, i32
  }
  func.func @transform_6(%arg0: i32) -> (i32, i32) {
    %c0_i32 = arith.constant 0 : i32
    %c0_i32_0 = arith.constant 0 : i32
    %c0_i32_1 = arith.constant 0 : i32
    return %c0_i32, %c0_i32_0 : i32, i32
  }
  func.func @transform_7(%arg0: i32) -> (i32, i32) {
    %c0_i32 = arith.constant 0 : i32
    %c0_i32_0 = arith.constant 0 : i32
    return %arg0, %c0_i32 : i32, i32
  }
}

module attributes {stable_mosaic.version = 11 : i64} {
  func.func @prop_kernel(%arg0: i32, %arg1: i32, %arg2: memref<128x128xbf16, #tpu.memory_space<vmem>>, %arg3: memref<128x128xbf16, #tpu.memory_space<vmem>>, %arg4: memref<128x128xf32, #tpu.memory_space<vmem>>) attributes {dimension_semantics = [#tpu.dimension_semantics<parallel>, #tpu.dimension_semantics<arbitrary>], iteration_bounds = array<i64: 2, 2>, scalar_prefetch = 0 : i64, scratch_operands = 0 : i64, tpu.core_type = #tpu.core_type<tc>, window_params = [{transform_indices = @transform_0, window_bounds = array<i64: 128, 128>}, {transform_indices = @transform_1, window_bounds = array<i64: 128, 128>}, {transform_indices = @transform_2, window_bounds = array<i64: 128, 128>}]} {
    %c0_i32 = arith.constant 0 : i32
    %0 = arith.cmpi eq, %arg1, %c0_i32 : i32
    %1 = arith.extui %0 : i1 to i32
    %c0_i32_0 = arith.constant 0 : i32
    %2 = arith.cmpi ne, %1, %c0_i32_0 : i32
    scf.if %2 {
      %cst_8 = arith.constant 0.000000e+00 : f32
      %9 = vector.broadcast %cst_8 : f32 to vector<128x128xf32>
      %c0_9 = arith.constant 0 : index
      %c0_10 = arith.constant 0 : index
      %10 = vector.load %arg4[%c0_9, %c0_10] : memref<128x128xf32, #tpu.memory_space<vmem>>, vector<128x128xf32>
      tpu.vector_store %arg4[%c0_9, %c0_10], %9 {strides = array<i32>} : memref<128x128xf32, #tpu.memory_space<vmem>>, vector<128x128xf32>,
    } else {
    }
    %c0 = arith.constant 0 : index
    %c0_1 = arith.constant 0 : index
    %3 = vector.load %arg4[%c0, %c0_1] : memref<128x128xf32, #tpu.memory_space<vmem>>, vector<128x128xf32>
    %c0_2 = arith.constant 0 : index
    %c0_3 = arith.constant 0 : index
    %4 = vector.load %arg2[%c0_2, %c0_3] : memref<128x128xbf16, #tpu.memory_space<vmem>>, vector<128x128xbf16>
    %c0_4 = arith.constant 0 : index
    %c0_5 = arith.constant 0 : index
    %5 = vector.load %arg3[%c0_4, %c0_5] : memref<128x128xbf16, #tpu.memory_space<vmem>>, vector<128x128xbf16>
    %cst = arith.constant dense<0.000000e+00> : vector<128x128xf32>
    %6 = tpu.matmul %4, %5, %cst {dimension_numbers = #tpu.dot_dimension_numbers<[1], [0], [0], [1], [0, 0, 1, 1], [], []>} : vector<128x128xbf16>, vector<128x128xbf16>, vector<128x128xf32> -> vector<128x128xf32>
    %7 = arith.addf %3, %6 : vector<128x128xf32>
    %c0_6 = arith.constant 0 : index
    %c0_7 = arith.constant 0 : index
    %8 = vector.load %arg4[%c0_6, %c0_7] : memref<128x128xf32, #tpu.memory_space<vmem>>, vector<128x128xf32>
    tpu.vector_store %arg4[%c0_6, %c0_7], %7 {strides = array<i32>} : memref<128x128xf32, #tpu.memory_space<vmem>>, vector<128x128xf32>,
    return
  }
  func.func @transform_0(%arg0: i32, %arg1: i32) -> (i32, i32) {
    %c0_i32 = arith.constant 0 : i32
    return %arg0, %arg1 : i32, i32
  }
  func.func @transform_1(%arg0: i32, %arg1: i32) -> (i32, i32) {
    %c0_i32 = arith.constant 0 : i32
    %c0_i32_0 = arith.constant 0 : i32
    return %arg1, %c0_i32 : i32, i32
  }
  func.func @transform_2(%arg0: i32, %arg1: i32) -> (i32, i32) {
    %c0_i32 = arith.constant 0 : i32
    %c0_i32_0 = arith.constant 0 : i32
    return %arg0, %c0_i32 : i32, i32
  }
}

</mosaic_0001>

<bundles_post_ra>
// kernel: _ppnpx_forward.3
= control target key start
LH: loop header
LB: loop body
LE: loop exit
PB: predicated region body
PF: predicated region fallthrough
CT: control target
= control target key end

     0   :  { %s911_s9 = smov 0   ;;  %s913_s10 = smov 0   ;;  %s1092_s0 = inlined_call_operand.vmem [shape: bf16[256,256], index: 0, kind: input, shape index: {}]   ;;  %s1093_s1 = inlined_call_operand.vmem [shape: bf16[256,128], index: 1, kind: input, shape index: {}]   ;;  %s1094_s2 = inlined_call_operand.vmem [shape: f32[256,128], index: 2, kind: output, shape index: {}]  }
   0x1   :  { %s915_s11 = smov 0   ;;  %s917_s12 = smov 0  }
   0x2   :  { %s919_s13 = smov 0   ;;  %s921_s14 = smov 0  }
   0x3   :  { %s923_s15 = smov 0  }
   0x4 LB: > { %s21_s16 = sadd.s32 1, %s885_s13  ;;  %s24_s17 = sadd.s32 1, %s889_s14  ;;  %s893_s15 = sphi %s923_s15, %s12_s15   ;;  %s889_s14 = sphi %s921_s14, %s1100_s14   ;;  %s885_s13 = sphi %s919_s13, %s1099_s13   ;;  %s881_s12 = sphi %s917_s12, %s1098_s12   ;;  %s877_s11 = sphi %s915_s11, %s1097_s11   ;;  %s873_s10 = sphi %s913_s10, %s1096_s10   ;;  %s869_s9 = sphi %s911_s9, %s1095_s9  }
   0x5   : > { %p22_p0 = scmp.ge.s32.totalorder %s21_s16, 2  ;;  %p40_p1 = scmp.ne.s32.totalorder %s873_s10, %s869_s9 }
   0x6   : > { %p41_p2 = scmp.eq.s32.totalorder %s893_s15, 0  ;;  %s33_s21 = sadd.s32 1, %s873_s10 }
   0x7   : > { %s1102_s16 = smov (%p22_p0, %s21_s16), 0  ;;  %s1104_s17 = smov (!%p22_p0, %s24_s17), %s889_s14 }
   0x8   : > { %p42_p3 = por %p41_p2, %p40_p1  ;;  %p26_p4 = scmp.ge.s32.totalorder %s1104_s17, 2 }
   0x9   : > { %s29_s18 = ssub.s32 %s885_s13, %s1102_s16  ;;  %p671_p6 = scmp.ge.s32.totalorder %s893_s15, 4 }
   0xa   : > { %s1106_s17 = smov (%p26_p4, %s1104_s17), 0 }
   0xb   : > { %s28_s19 = ssub.s32 %s889_s14, %s1106_s17  ;;  %118 = sbr.rel (%p671_p6) target bundleno = 34 (0x22), region = 16 }
   0xc   : > { %s30_s20 = sor.u32 %s29_s18, %s28_s19 }
   0xd   : > { %p31_p5 = scmp.eq.s32.totalorder %s30_s20, 0 }
   0xf   : > { %s962_s22 = scalar_select %p31_p5, %s873_s10, %s33_s21  }
  0x12   : > { %121 = sbr.rel (!%p42_p3) target bundleno = 34 (0x22), region = 20  ;;  %s123_s23 = sand.u32 (%p42_p3), 1, %s873_s10  }
  0x13   : > { %s701_s24 = sshll.u32 (%p42_p3), %s889_s14, 5  ;;  %s672_s25 = sshll.u32 (%p42_p3), %s123_s23, 6 }
  0x14   : > { %s128_s26 = sadd.s32 (%p42_p3), %s885_s13, %s701_s24  ;;  %s125_s3 = scalar_lea.vmem (%p42_p3), [#allocation2], %s672_s25 }
  0x15   : > { %s675_s27 = sshll.u32 (%p42_p3), %s128_s26, 2 }
  0x16   : > { %s971_s30 = scalar_lea.vmem (%p42_p3), %s1092_s0, %s675_s27 }
  0x17   : > { %v146_v0 = vld [vmem:[%s971_s30] sm:$0xf] (%p42_p3)  ;;  %v148_v1 = vld [vmem:[%s971_s30 + $0x8] sm:$0xf] (%p42_p3)  ;;  %v150_v2 = vld [vmem:[%s971_s30 + $0x10] sm:$0xf] (%p42_p3) }
  0x18   : > { %147 = vst [vmem:[%s125_s3] sm:$0xf] (%p42_p3), %v146_v0  ;;  %149 = vst [vmem:[%s125_s3 + $0x4] sm:$0xf] (%p42_p3), %v148_v1  ;;  %v152_v3 = vld [vmem:[%s971_s30 + $0x18] sm:$0xf] (%p42_p3) }
  0x19   : > { %151 = vst [vmem:[%s125_s3 + $0x8] sm:$0xf] %v150_v2  ;;  %v154_v4 = vld [vmem:[%s971_s30 + $0x20] sm:$0xf]  ;;  %v156_v5 = vld [vmem:[%s971_s30 + $0x28] sm:$0xf] }
  0x1a   : > { %153 = vst [vmem:[%s125_s3 + $0xc] sm:$0xf] %v152_v3  ;;  %155 = vst [vmem:[%s125_s3 + $0x10] sm:$0xf] %v154_v4  ;;  %v158_v6 = vld [vmem:[%s971_s30 + $0x30] sm:$0xf] }
  0x1b   : > { %157 = vst [vmem:[%s125_s3 + $0x14] sm:$0xf] %v156_v5  ;;  %v160_v7 = vld [vmem:[%s971_s30 + $0x38] sm:$0xf]  ;;  %v162_v8 = vld [vmem:[%s971_s30 + $0x40] sm:$0xf] }
  0x1c   : > { %159 = vst [vmem:[%s125_s3 + $0x18] sm:$0xf] %v158_v6  ;;  %161 = vst [vmem:[%s125_s3 + $0x1c] sm:$0xf] %v160_v7  ;;  %v164_v9 = vld [vmem:[%s971_s30 + $0x48] sm:$0xf] }
  0x1d   : > { %163 = vst [vmem:[%s125_s3 + $0x20] sm:$0xf] %v162_v8  ;;  %v166_v10 = vld [vmem:[%s971_s30 + $0x50] sm:$0xf]  ;;  %v168_v11 = vld [vmem:[%s971_s30 + $0x58] sm:$0xf] }
  0x1e   : > { %165 = vst [vmem:[%s125_s3 + $0x24] sm:$0xf] %v164_v9  ;;  %167 = vst [vmem:[%s125_s3 + $0x28] sm:$0xf] %v166_v10  ;;  %v170_v12 = vld [vmem:[%s971_s30 + $0x60] sm:$0xf] }
  0x1f   : > { %169 = vst [vmem:[%s125_s3 + $0x2c] sm:$0xf] %v168_v11  ;;  %v172_v13 = vld [vmem:[%s971_s30 + $0x68] sm:$0xf]  ;;  %v174_v14 = vld [vmem:[%s971_s30 + $0x70] sm:$0xf] }
  0x20   : > { %171 = vst [vmem:[%s125_s3 + $0x30] sm:$0xf] %v170_v12  ;;  %173 = vst [vmem:[%s125_s3 + $0x34] sm:$0xf] %v172_v13  ;;  %v176_v15 = vld [vmem:[%s971_s30 + $0x78] sm:$0xf] }
  0x21   : > { %175 = vst [vmem:[%s125_s3 + $0x38] sm:$0xf] %v174_v14  ;;  %177 = vst [vmem:[%s125_s3 + $0x3c] sm:$0xf] %v176_v15 }
  0x22 PF: > { %p676_p7 = scmp.ge.s32.totalorder %s893_s15, 1  ;;  %p240_p8 = scmp.lt.s32.totalorder %s893_s15, 5 }
  0x24   : > { %p241_p9 = pnand %p676_p7, %p240_p8 }
  0x25   : > { %s247_s4 = sand.u32 (!%p241_p9), 1, %s869_s9   ;;  %s678_s5 = sshll.u32 (!%p241_p9), %s877_s11, 4 }
  0x26   : > { %244 = sbr.rel (%p241_p9) target bundleno = 315 (0x13b), region = 65  ;;  %s677_s6 = sshll.u32 (!%p241_p9), %s247_s4, 6 }
  0x27   : > { %p275_p10 = scmp.lt.s32.totalorder (!%p241_p9), %s678_s5, 31  ;;  %s680_s7 = sshll.u32 (!%p241_p9), %s881_s12, 4 }
  0x28   : > { %p281_p11 = scmp.lt.s32.totalorder (!%p241_p9), %s680_s7, 31  ;;  %s1004_s9 = scalar_lea.vmem (!%p241_p9), [#allocation2], %s677_s6 }
  0x29   : > { %p682_p12 = scmp.ne.s32.totalorder (!%p241_p9), %s877_s11, 0 }
  0x2d   : > { %s1108_s5 = smov (!%p275_p10, %s678_s5), 31  ;;  %s1110_s7 = smov (!%p281_p11, %s680_s7), 31 }
  0x2e   : > { %s679_s8 = sshll.u32 %s1108_s5, 2  ;;  %s681_s21 = sshll.u32 %s1110_s7, 3  ;;  %v895_v16 = vmov (!%p682_p12), 0.0  }
  0x2f   : > { %s997_s20 = scalar_lea.vmem %s1093_s1, %s679_s8  ;;  %s1002_s25 = scalar_lea.vmem %s1094_s2, %s681_s21 }
  0x30   : > { %290 = sbr.rel (%p682_p12) target bundleno = 56 (0x38), region = 73  ;;  %291 = vst [vmem:[%s1002_s25] sm:$0xff] (!%p682_p12), %v895_v16  ;;  %292 = vst [vmem:[%s1002_s25 + $0x8] sm:$0xff] (!%p682_p12), %v895_v16 }
  0x31   : > { %293 = vst [vmem:[%s1002_s25 + $0x10] sm:$0xff] (!%p682_p12), %v895_v16  ;;  %294 = vst [vmem:[%s1002_s25 + $0x18] sm:$0xff] (!%p682_p12), %v895_v16 }
  0x32   : > { %295 = vst [vmem:[%s1002_s25 + $0x20] sm:$0xff] (!%p682_p12), %v895_v16  ;;  %296 = vst [vmem:[%s1002_s25 + $0x28] sm:$0xff] (!%p682_p12), %v895_v16 }
  0x33   : > { %297 = vst [vmem:[%s1002_s25 + $0x30] sm:$0xff] (!%p682_p12), %v895_v16  ;;  %298 = vst [vmem:[%s1002_s25 + $0x38] sm:$0xff] (!%p682_p12), %v895_v16 }
  0x34   : > { %299 = vst [vmem:[%s1002_s25 + $0x40] sm:$0xff] (!%p682_p12), %v895_v16  ;;  %300 = vst [vmem:[%s1002_s25 + $0x48] sm:$0xff] (!%p682_p12), %v895_v16 }
  0x35   : > { %301 = vst [vmem:[%s1002_s25 + $0x50] sm:$0xff] (!%p682_p12), %v895_v16  ;;  %302 = vst [vmem:[%s1002_s25 + $0x58] sm:$0xff] (!%p682_p12), %v895_v16 }
  0x36   : > { %303 = vst [vmem:[%s1002_s25 + $0x60] sm:$0xff] (!%p682_p12), %v895_v16  ;;  %304 = vst [vmem:[%s1002_s25 + $0x68] sm:$0xff] (!%p682_p12), %v895_v16 }
  0x37   : > { %305 = vst [vmem:[%s1002_s25 + $0x70] sm:$0xff] %v895_v16  ;;  %306 = vst [vmem:[%s1002_s25 + $0x78] sm:$0xff] %v895_v16 }
  0x38 PF: > { %v823_v17 = vld [vmem:[%s997_s20] sm:$0xff]   ;;  %v824_v18 = vld [vmem:[%s997_s20 + $0x8] sm:$0xff]   ;;  %v825_v19 = vld [vmem:[%s997_s20 + $0x10] sm:$0xff]  }
  0x39   : > { %718 = vmatprep.subr.bf16.mxu0 %v823_v17  ;;  %750 = vmatprep.subr.bf16.mxu1 %v823_v17  ;;  %v826_v20 = vld [vmem:[%s997_s20 + $0x18] sm:$0xff]   ;;  %v831_v21 = vld [vmem:[%s1004_s9] sm:$0xff]   ;;  %v828_v24 = vld [vmem:[%s997_s20 + $0x28] sm:$0xff]  }
  0x3a   : > { %719 = vmatpush3.bf16.msra.mxu0 %v823_v17  ;;  %758 = vmatpush3.bf16.msra.mxu1 %v823_v17  ;;  %v832_v22 = vld [vmem:[%s1004_s9 + $0x20] sm:$0xff]   ;;  %v829_v25 = vld [vmem:[%s997_s20 + $0x30] sm:$0xff]   ;;  %v830_v26 = vld [vmem:[%s997_s20 + $0x38] sm:$0xff]  }
  0x3b   : > { %720 = vmatprep.subr.bf16.mxu0 %v824_v18  ;;  %751 = vmatprep.subr.bf16.mxu1 %v824_v18  ;;  %v827_v23 = vld [vmem:[%s997_s20 + $0x20] sm:$0xff]   ;;  %v833_v27 = vld [vmem:[%s1004_s9 + $0x8] sm:$0xff]   ;;  %v835_v29 = vld [vmem:[%s1004_s9 + $0x10] sm:$0xff]  }
  0x3c   : > { %734 = vmatprep.mubr.bf16.mxu0 %v831_v21  ;;  %742 = vmatprep.mubr.bf16.mxu1 %v832_v22  ;;  %v834_v28 = vld [vmem:[%s1004_s9 + $0x28] sm:$0xff]   ;;  %v836_v30 = vld [vmem:[%s1004_s9 + $0x30] sm:$0xff]   ;;  %v837_v31 = vld [vmem:[%s1004_s9 + $0x18] sm:$0xff]  }
  0x3d   : > { %v838_v32 = vld [vmem:[%s1004_s9 + $0x38] sm:$0xff]   ;;  %v309_v33 = vld [vmem:[%s1002_s25 + $0x10] sm:$0xff]  ;;  %v307_v35 = vld [vmem:[%s1002_s25] sm:$0xff] }
  0x3e   : > { %721 = vmatpush3.bf16.msra.mxu0 %v824_v18  ;;  %759 = vmatpush3.bf16.msra.mxu1 %v824_v18  ;;  %v317_v34 = vld [vmem:[%s1002_s25 + $0x50] sm:$0xff]  ;;  %v315_v36 = vld [vmem:[%s1002_s25 + $0x40] sm:$0xff]  ;;  %v310_v39 = vld [vmem:[%s1002_s25 + $0x18] sm:$0xff] }
  0x3f   : > { %722 = vmatprep.subr.bf16.mxu0 %v825_v19  ;;  %752 = vmatprep.subr.bf16.mxu1 %v825_v19  ;;  %v318_v40 = vld [vmem:[%s1002_s25 + $0x58] sm:$0xff]  ;;  %v308_v45 = vld [vmem:[%s1002_s25 + $0x8] sm:$0xff]  ;;  %v313_v57 = vld [vmem:[%s1002_s25 + $0x30] sm:$0xff] }
  0x40   : > { %v316_v46 = vld [vmem:[%s1002_s25 + $0x48] sm:$0xff]  ;;  %v321_v58 = vld [vmem:[%s1002_s25 + $0x70] sm:$0xff]  ;;  %v311_v59 = vld [vmem:[%s1002_s25 + $0x20] sm:$0xff] }
  0x41   : > { %v319_v60 = vld [vmem:[%s1002_s25 + $0x60] sm:$0xff]  ;;  %v314_v63 = vld [vmem:[%s1002_s25 + $0x38] sm:$0xff]  ;;  %v312_v5 = vld [vmem:[%s1002_s25 + $0x28] sm:$0xff] }
  0x42   : > { %723 = vmatpush3.bf16.msra.mxu0 %v825_v19  ;;  %760 = vmatpush3.bf16.msra.mxu1 %v825_v19  ;;  %v322_v0 = vld [vmem:[%s1002_s25 + $0x78] sm:$0xff]  ;;  %v320_v6 = vld [vmem:[%s1002_s25 + $0x68] sm:$0xff] }
  0x43   : > { %724 = vmatprep.subr.bf16.mxu0 %v826_v20  ;;  %753 = vmatprep.subr.bf16.mxu1 %v826_v20 }
  0x46   : > { %725 = vmatpush3.bf16.msra.mxu0 %v826_v20  ;;  %761 = vmatpush3.bf16.msra.mxu1 %v826_v20 }
  0x47   : > { %726 = vmatprep.subr.bf16.mxu0 %v827_v23  ;;  %754 = vmatprep.subr.bf16.mxu1 %v827_v23 }
  0x4a   : > { %727 = vmatpush3.bf16.msra.mxu0 %v827_v23  ;;  %762 = vmatpush3.bf16.msra.mxu1 %v827_v23 }
  0x4b   : > { %728 = vmatprep.subr.bf16.mxu0 %v828_v24  ;;  %755 = vmatprep.subr.bf16.mxu1 %v828_v24 }
  0x4e   : > { %729 = vmatpush3.bf16.msra.mxu0 %v828_v24  ;;  %763 = vmatpush3.bf16.msra.mxu1 %v828_v24 }
  0x4f   : > { %730 = vmatprep.subr.bf16.mxu0 %v829_v25  ;;  %756 = vmatprep.subr.bf16.mxu1 %v829_v25 }
  0x52   : > { %731 = vmatpush3.bf16.msra.mxu0 %v829_v25  ;;  %764 = vmatpush3.bf16.msra.mxu1 %v829_v25 }
  0x53   : > { %732 = vmatprep.subr.bf16.mxu0 %v830_v26  ;;  %757 = vmatprep.subr.bf16.mxu1 %v830_v26 }
  0x56   : > { %733 = vmatpush3.bf16.msra.mxu0 %v830_v26  ;;  %765 = vmatpush3.bf16.msra.mxu1 %v830_v26 }
  0x59   : > { %735 = vmatmul.mubr.bf16.vlgmr.msra.gmra.mrb[0].mxu0 %v833_v27  ;;  %743 = vmatmul.mubr.bf16.vlgmr.msra.gmra.mrb[0].mxu1 %v834_v28 }
  0x5a   : > { %738 = vmatprep.mubr.bf16.mxu0 %v835_v29  ;;  %746 = vmatprep.mubr.bf16.mxu1 %v836_v30 }
  0x61   : > { %739 = vmatmul.mubr.bf16.gmra.mrb[4].mxu0 %v837_v31  ;;  %747 = vmatmul.mubr.bf16.gmra.mrb[4].mxu1 %v838_v32 }
 0x12c   : > { %v736_v37 = vpop.f32.mrb[0].mxu0  ;;  %v744_v38 = vpop.f32.mrb[0].mxu1 }
 0x12d   : > { %v550_v41 = vadd.f32 %v736_v37, %v309_v33  ;;  %v558_v42 = vadd.f32 %v744_v38, %v317_v34  ;;  %v485_v43 = vpop.f32.mrb[1].mxu0  ;;  %v517_v44 = vpop.f32.mrb[1].mxu1 }
 0x12e   : > { %v548_v47 = vadd.f32 %v485_v43, %v307_v35  ;;  %v556_v48 = vadd.f32 %v517_v44, %v315_v36  ;;  %v737_v49 = vpop.f32.mrb[2].mxu0  ;;  %v745_v50 = vpop.f32.mrb[2].mxu1 }
 0x12f   : > { %566 = vst [vmem:[%s1002_s25 + $0x10] sm:$0xff] %v550_v41  ;;  %574 = vst [vmem:[%s1002_s25 + $0x50] sm:$0xff] %v558_v42  ;;  %v551_v51 = vadd.f32 %v737_v49, %v310_v39  ;;  %v559_v52 = vadd.f32 %v745_v50, %v318_v40  ;;  %v488_v53 = vpop.f32.mrb[3].mxu0  ;;  %v520_v54 = vpop.f32.mrb[3].mxu1 }
 0x130   : > { %564 = vst [vmem:[%s1002_s25] sm:$0xff] %v548_v47  ;;  %572 = vst [vmem:[%s1002_s25 + $0x40] sm:$0xff] %v556_v48  ;;  %v549_v55 = vadd.f32 %v488_v53, %v308_v45  ;;  %v557_v56 = vadd.f32 %v520_v54, %v316_v46 }
 0x131   : > { %567 = vst [vmem:[%s1002_s25 + $0x18] sm:$0xff] %v551_v51  ;;  %575 = vst [vmem:[%s1002_s25 + $0x58] sm:$0xff] %v559_v52 }
 0x132   : > { %565 = vst [vmem:[%s1002_s25 + $0x8] sm:$0xff] %v549_v55  ;;  %573 = vst [vmem:[%s1002_s25 + $0x48] sm:$0xff] %v557_v56 }
 0x134   : > { %v740_v61 = vpop.f32.mrb[4].mxu0  ;;  %v748_v62 = vpop.f32.mrb[4].mxu1 }
 0x135   : > { %v554_v1 = vadd.f32 %v740_v61, %v313_v57  ;;  %v562_v2 = vadd.f32 %v748_v62, %v321_v58  ;;  %v501_v3 = vpop.f32.mrb[5].mxu0  ;;  %v533_v4 = vpop.f32.mrb[5].mxu1 }
 0x136   : > { %v552_v7 = vadd.f32 %v501_v3, %v311_v59  ;;  %v560_v8 = vadd.f32 %v533_v4, %v319_v60  ;;  %v741_v9 = vpop.f32.mrb[6].mxu0  ;;  %v749_v10 = vpop.f32.mrb[6].mxu1 }
 0x137   : > { %570 = vst [vmem:[%s1002_s25 + $0x30] sm:$0xff] %v554_v1  ;;  %578 = vst [vmem:[%s1002_s25 + $0x70] sm:$0xff] %v562_v2  ;;  %v555_v11 = vadd.f32 %v741_v9, %v314_v63  ;;  %v563_v12 = vadd.f32 %v749_v10, %v322_v0  ;;  %v504_v13 = vpop.f32.mrb[7].mxu0  ;;  %v536_v14 = vpop.f32.mrb[7].mxu1 }
 0x138   : > { %568 = vst [vmem:[%s1002_s25 + $0x20] sm:$0xff] %v552_v7  ;;  %576 = vst [vmem:[%s1002_s25 + $0x60] sm:$0xff] %v560_v8  ;;  %v553_v15 = vadd.f32 %v504_v13, %v312_v5  ;;  %v561_v16 = vadd.f32 %v536_v14, %v320_v6 }
 0x139   : > { %571 = vst [vmem:[%s1002_s25 + $0x38] sm:$0xff] %v555_v11  ;;  %579 = vst [vmem:[%s1002_s25 + $0x78] sm:$0xff] %v563_v12 }
 0x13a   : > { %569 = vst [vmem:[%s1002_s25 + $0x28] sm:$0xff] %v553_v15  ;;  %577 = vst [vmem:[%s1002_s25 + $0x68] sm:$0xff] %v561_v16 }
 0x13b PF: > { %s12_s15 = sadd.s32 1, %s893_s15   ;;  %s1095_s9 = smov %s873_s10 }
 0x13c   : > { %p9_p13 = scmp.ge.s32.totalorder %s12_s15, 6   ;;  %s1096_s10 = smov %s962_s22 }
 0x13d   : > { %s1097_s11 = smov %s885_s13  ;;  %s1098_s12 = smov %s889_s14 }
 0x13e   : > { %s1099_s13 = smov %s1102_s16  ;;  %s1100_s14 = smov %s1106_s17 }
 0x13f   :  { %11 = sbr.rel (!%p9_p13) target bundleno = 4 (0x4), region = 111 }

// kernel: _ppnpx_forward.2
= control target key start
LH: loop header
LB: loop body
LE: loop exit
PB: predicated region body
PF: predicated region fallthrough
CT: control target
= control target key end

     0   :  { %s1495_s24 = smov 0   ;;  %s1739_s0 = inlined_call_operand.vmem [shape: f32[256,128], index: 0, kind: input, shape index: {}]   ;;  %s1740_s1 = inlined_call_operand.vmem [shape: f32[128,128], index: 1, kind: input, shape index: {}]   ;;  %s1741_s2 = inlined_call_operand.vmem [shape: f32[1,128], index: 2, kind: input, shape index: {}]   ;;  %s1742_s3 = inlined_call_operand.vmem [shape: f32[128,128], index: 3, kind: input, shape index: {}]   ;;  %s1743_s4 = inlined_call_operand.vmem [shape: f32[1,128], index: 4, kind: input, shape index: {}]   ;;  %s1744_s5 = inlined_call_operand.vmem [shape: f32[128,128], index: 5, kind: input, shape index: {}]   ;;  %s1745_s6 = inlined_call_operand.vmem [shape: f32[1,128], index: 6, kind: input, shape index: {}]   ;;  %s1746_s7 = inlined_call_operand.vmem [shape: bf16[256,128], index: 7, kind: output, shape index: {}]  }
   0x1 LB: > { %s970_s25 = sadd.s32 4294967295, %s1453_s24   ;;  %p974_p0 = scmp.ge.s32.totalorder %s1453_s24, 1  ;;  %s1453_s24 = sphi %s1495_s24, %s17_s24  }
   0x2   : > { %p238_p1 = scmp.lt.s32.totalorder %s1453_s24, 3 }
   0x4   : > { %p239_p2 = pnand %p974_p0, %p238_p1 }
   0x5   : > { %v298_v0 = vld [vmem:[%s1740_s1] sm:$0xff] (!%p239_p2)  ;;  %v299_v1 = vld [vmem:[%s1740_s1 + $0x8] sm:$0xff] (!%p239_p2)  ;;  %v300_v2 = vld [vmem:[%s1740_s1 + $0x10] sm:$0xff] (!%p239_p2)  ;;  %s975_s9 = sshll.u32 (!%p239_p2), %s970_s25, 4 }
   0x6   : > { %242 = sbr.rel (%p239_p2) target bundleno = 722 (0x2d2), region = 48  ;;  %v1327_v3 = vpack.c.bf16 (!%p239_p2), %v299_v1, %v298_v0  ;;  %v301_v4 = vld [vmem:[%s1740_s1 + $0x18] sm:$0xff] (!%p239_p2)  ;;  %p271_p3 = scmp.lt.s32.totalorder (!%p239_p2), %s975_s9, 31  ;;  %v302_v6 = vld [vmem:[%s1740_s1 + $0x20] sm:$0xff] (!%p239_p2)  ;;  %v303_v7 = vld [vmem:[%s1740_s1 + $0x28] sm:$0xff] (!%p239_p2) }
   0x7   : > { %v1331_v5 = vpack.c.bf16 (!%p239_p2), %v301_v4, %v300_v2  ;;  %v1335_v8 = vpack.c.bf16 (!%p239_p2), %v303_v7, %v302_v6  ;;  %v304_v9 = vld [vmem:[%s1740_s1 + $0x30] sm:$0xff] (!%p239_p2)  ;;  %v482_v10 = vld [vmem:[%s1742_s3] sm:$0xff] (!%p239_p2)  ;;  %v483_v11 = vld [vmem:[%s1742_s3 + $0x8] sm:$0xff] (!%p239_p2) }
   0x8   : > { %1328 = vmatprep.subr.bf16.mxu0 (!%p239_p2), %v1327_v3  ;;  %v305_v12 = vld [vmem:[%s1740_s1 + $0x38] sm:$0xff] (!%p239_p2)  ;;  %v1359_v13 = vpack.c.bf16 (!%p239_p2), %v483_v11, %v482_v10  ;;  %v484_v14 = vld [vmem:[%s1742_s3 + $0x10] sm:$0xff] (!%p239_p2)  ;;  %v306_v19 = vld [vmem:[%s1740_s1 + $0x40] sm:$0xff] (!%p239_p2) }
   0x9   : > { %1330 = vmatpush3.bf16.msra.mxu0 (!%p239_p2), %v1327_v3  ;;  %v485_v15 = vld [vmem:[%s1742_s3 + $0x18] sm:$0xff] (!%p239_p2)  ;;  %v1339_v18 = vpack.c.bf16 (!%p239_p2), %v305_v12, %v304_v9  ;;  %v307_v20 = vld [vmem:[%s1740_s1 + $0x48] sm:$0xff] (!%p239_p2)  ;;  %v486_v21 = vld [vmem:[%s1742_s3 + $0x20] sm:$0xff] (!%p239_p2) }
   0xa   : > { %1332 = vmatprep.subr.bf16.mxu0 (!%p239_p2), %v1331_v5  ;;  %v1363_v17 = vpack.c.bf16 (!%p239_p2), %v485_v15, %v484_v14  ;;  %1360 = vmatprep.subr.bf16.mxu1 (!%p239_p2), %v1359_v13  ;;  %v487_v22 = vld [vmem:[%s1742_s3 + $0x28] sm:$0xff] (!%p239_p2)  ;;  %v488_v23 = vld [vmem:[%s1742_s3 + $0x30] sm:$0xff] (!%p239_p2)  ;;  %v1343_v24 = vpack.c.bf16 (!%p239_p2), %v307_v20, %v306_v19  ;;  %v489_v26 = vld [vmem:[%s1742_s3 + $0x38] sm:$0xff] (!%p239_p2) }
   0xb   : > { %1362 = vmatpush3.bf16.msra.mxu1 (!%p239_p2), %v1359_v13  ;;  %v1367_v25 = vpack.c.bf16 (!%p239_p2), %v487_v22, %v486_v21  ;;  %v308_v27 = vld [vmem:[%s1740_s1 + $0x50] sm:$0xff] (!%p239_p2)  ;;  %v309_v28 = vld [vmem:[%s1740_s1 + $0x58] sm:$0xff] (!%p239_p2)  ;;  %v1371_v29 = vpack.c.bf16 (!%p239_p2), %v489_v26, %v488_v23  ;;  %v490_v30 = vld [vmem:[%s1742_s3 + $0x40] sm:$0xff] (!%p239_p2) }
   0xc   : > { %1364 = vmatprep.subr.bf16.mxu1 (!%p239_p2), %v1363_v17  ;;  %v491_v31 = vld [vmem:[%s1742_s3 + $0x48] sm:$0xff] (!%p239_p2)  ;;  %v1347_v32 = vpack.c.bf16 (!%p239_p2), %v309_v28, %v308_v27  ;;  %v310_v33 = vld [vmem:[%s1740_s1 + $0x60] sm:$0xff] (!%p239_p2)  ;;  %v492_v36 = vld [vmem:[%s1742_s3 + $0x50] sm:$0xff] (!%p239_p2) }
   0xd   : > { %s1748_s9 = smov (!%p271_p3, %s975_s9), 31  ;;  %1334 = vmatpush3.bf16.msra.mxu0 %v1331_v5  ;;  %v311_v34 = vld [vmem:[%s1740_s1 + $0x68] sm:$0xff]  ;;  %v1375_v35 = vpack.c.bf16 %v491_v31, %v490_v30  ;;  %v493_v37 = vld [vmem:[%s1742_s3 + $0x58] sm:$0xff]  ;;  %v312_v39 = vld [vmem:[%s1740_s1 + $0x70] sm:$0xff] }
   0xe   : > { %s976_s18 = sshll.u32 %s1748_s9, 3  ;;  %1336 = vmatprep.subr.bf16.mxu0 %v1335_v8  ;;  %v1351_v38 = vpack.c.bf16 %v311_v34, %v310_v33  ;;  %v313_v40 = vld [vmem:[%s1740_s1 + $0x78] sm:$0xff]  ;;  %v1379_v41 = vpack.c.bf16 %v493_v37, %v492_v36  ;;  %v494_v42 = vld [vmem:[%s1742_s3 + $0x60] sm:$0xff]  ;;  %v495_v43 = vld [vmem:[%s1742_s3 + $0x68] sm:$0xff]  ;;  %s978_s29 = sshll.u32 %s1748_s9, 2 }
   0xf   : > { %s1539_s28 = scalar_lea.vmem %s1739_s0, %s976_s18  ;;  %1366 = vmatpush3.bf16.msra.mxu1 %v1363_v17  ;;  %v1355_v44 = vpack.c.bf16 %v313_v40, %v312_v39  ;;  %v1383_v45 = vpack.c.bf16 %v495_v43, %v494_v42  ;;  %v496_v61 = vld [vmem:[%s1742_s3 + $0x70] sm:$0xff]  ;;  %v497_v62 = vld [vmem:[%s1742_s3 + $0x78] sm:$0xff]  ;;  %v666_v0 = vld [vmem:[%s1744_s5] sm:$0xff]  ;;  %s1726_s10 = scalar_lea.vmem %s1746_s7, %s978_s29 }
  0x10   : > { %v282_v16 = vld [vmem:[%s1539_s28] sm:$0xff]  ;;  %1368 = vmatprep.subr.bf16.mxu1 %v1367_v25  ;;  %v283_v46 = vld [vmem:[%s1539_s28 + $0x8] sm:$0xff]  ;;  %v284_v47 = vld [vmem:[%s1539_s28 + $0x10] sm:$0xff]  ;;  %v1387_v63 = vpack.c.bf16 %v497_v62, %v496_v61 }
  0x11   : > { %1191 = vmatprep.mubr.f32.mxu0 %v282_v16  ;;  %1338 = vmatpush3.bf16.msra.mxu0 %v1335_v8  ;;  %v285_v48 = vld [vmem:[%s1539_s28 + $0x18] sm:$0xff]  ;;  %v286_v49 = vld [vmem:[%s1539_s28 + $0x20] sm:$0xff]  ;;  %v287_v50 = vld [vmem:[%s1539_s28 + $0x28] sm:$0xff] }
  0x12   : > { %1340 = vmatprep.subr.bf16.mxu0 %v1339_v18  ;;  %v288_v51 = vld [vmem:[%s1539_s28 + $0x30] sm:$0xff]  ;;  %v289_v52 = vld [vmem:[%s1539_s28 + $0x38] sm:$0xff]  ;;  %v290_v53 = vld [vmem:[%s1539_s28 + $0x40] sm:$0xff] }
  0x13   : > { %1370 = vmatpush3.bf16.msra.mxu1 %v1367_v25  ;;  %v291_v54 = vld [vmem:[%s1539_s28 + $0x48] sm:$0xff]  ;;  %v292_v55 = vld [vmem:[%s1539_s28 + $0x50] sm:$0xff]  ;;  %v293_v56 = vld [vmem:[%s1539_s28 + $0x58] sm:$0xff] }
  0x14   : > { %1372 = vmatprep.subr.bf16.mxu1 %v1371_v29  ;;  %v294_v57 = vld [vmem:[%s1539_s28 + $0x60] sm:$0xff]  ;;  %v295_v58 = vld [vmem:[%s1539_s28 + $0x68] sm:$0xff]  ;;  %v296_v59 = vld [vmem:[%s1539_s28 + $0x70] sm:$0xff] }
  0x15   : > { %1342 = vmatpush3.bf16.msra.mxu0 %v1339_v18  ;;  %v297_v60 = vld [vmem:[%s1539_s28 + $0x78] sm:$0xff]  ;;  %v667_v1 = vld [vmem:[%s1744_s5 + $0x8] sm:$0xff]  ;;  %v668_v2 = vld [vmem:[%s1744_s5 + $0x10] sm:$0xff] }
  0x16   : > { %1344 = vmatprep.subr.bf16.mxu0 %v1343_v24  ;;  %v1391_v3 = vpack.c.bf16 %v667_v1, %v666_v0  ;;  %v669_v4 = vld [vmem:[%s1744_s5 + $0x18] sm:$0xff]  ;;  %v670_v6 = vld [vmem:[%s1744_s5 + $0x20] sm:$0xff]  ;;  %v671_v7 = vld [vmem:[%s1744_s5 + $0x28] sm:$0xff] }
  0x17   : > { %1374 = vmatpush3.bf16.msra.mxu1 %v1371_v29  ;;  %v1395_v5 = vpack.c.bf16 %v669_v4, %v668_v2  ;;  %v1399_v8 = vpack.c.bf16 %v671_v7, %v670_v6  ;;  %v672_v9 = vld [vmem:[%s1744_s5 + $0x30] sm:$0xff]  ;;  %v673_v10 = vld [vmem:[%s1744_s5 + $0x38] sm:$0xff]  ;;  %v674_v12 = vld [vmem:[%s1744_s5 + $0x40] sm:$0xff] }
  0x18   : > { %1376 = vmatprep.subr.bf16.mxu1 %v1375_v35  ;;  %v1647_v11 = vpack.c.bf16 %v673_v10, %v672_v9  ;;  %v675_v13 = vld [vmem:[%s1744_s5 + $0x48] sm:$0xff]  ;;  %v676_v15 = vld [vmem:[%s1744_s5 + $0x50] sm:$0xff]  ;;  %v677_v16 = vld [vmem:[%s1744_s5 + $0x58] sm:$0xff] }
  0x19   : > { %1346 = vmatpush3.bf16.msra.mxu0 %v1343_v24  ;;  %v1656_v14 = vpack.c.bf16 %v675_v13, %v674_v12  ;;  %v1666_v17 = vpack.c.bf16 %v677_v16, %v676_v15  ;;  %v678_v18 = vld [vmem:[%s1744_s5 + $0x60] sm:$0xff]  ;;  %v679_v19 = vld [vmem:[%s1744_s5 + $0x68] sm:$0xff]  ;;  %v680_v6 = vld [vmem:[%s1744_s5 + $0x70] sm:$0xff] }
  0x1a   : > { %1348 = vmatprep.subr.bf16.mxu0 %v1347_v32  ;;  %v1676_v20 = vpack.c.bf16 %v679_v19, %v678_v18  ;;  %v1684_v21 = vld [vmem:[%s1741_s2] ss:$0 sm:$0xff]  ;;  %v681_v7 = vld [vmem:[%s1744_s5 + $0x78] sm:$0xff] }
  0x1b   : > { %1378 = vmatpush3.bf16.msra.mxu1 %v1375_v35  ;;  %v980_v9 = vld [vmem:[%s1743_s4] ss:$0 sm:$0xff] }
  0x1c   : > { %1380 = vmatprep.subr.bf16.mxu1 %v1379_v41 }
  0x1d   : > { %1350 = vmatpush3.bf16.msra.mxu0 %v1347_v32 }
  0x1e   : > { %1352 = vmatprep.subr.bf16.mxu0 %v1351_v38 }
  0x1f   : > { %1382 = vmatpush3.bf16.msra.mxu1 %v1379_v41 }
  0x20   : > { %1384 = vmatprep.subr.bf16.mxu1 %v1383_v45 }
  0x21   : > { %1354 = vmatpush3.bf16.msra.mxu0 %v1351_v38 }
  0x22   : > { %1356 = vmatprep.subr.bf16.mxu0 %v1355_v44 }
  0x23   : > { %1386 = vmatpush3.bf16.msra.mxu1 %v1383_v45 }
  0x24   : > { %1388 = vmatprep.subr.bf16.mxu1 %v1387_v63 }
  0x25   : > { %1358 = vmatpush3.bf16.msra.mxu0 %v1355_v44 }
  0x26   : > { %1392 = vmatprep.subr.bf16.mxu0 %v1391_v3 }
  0x27   : > { %1390 = vmatpush3.bf16.msra.mxu1 %v1387_v63 }
  0x28   : > { %1192 = vmatmul.mubr.f32.vlgmr.msra.gmra.mrb[0].mxu0 %v283_v46  ;;  %1423 = vmatprep.subr.bf16.mxu1 %v1391_v3 }
  0x29   : > { %1194 = vmatprep.mubr.f32.mxu0 %v284_v47  ;;  %1394 = vmatpush3.bf16.msra.mxu0 %v1391_v3 }
  0x2a   : > { %1396 = vmatprep.subr.bf16.mxu0 %v1395_v5 }
  0x2c   : > { %1195 = vmatmul.mubr.f32.gmra.mrb[2].mxu0 %v285_v48 }
  0x2d   : > { %1197 = vmatprep.mubr.f32.mxu0 %v286_v49  ;;  %1398 = vmatpush3.bf16.msra.mxu0 %v1395_v5 }
  0x2e   : > { %1400 = vmatprep.subr.bf16.mxu0 %v1399_v8 }
  0x30   : > { %1198 = vmatmul.mubr.f32.gmra.mrb[4].mxu0 %v287_v50 }
  0x31   : > { %1200 = vmatprep.mubr.f32.mxu0 %v288_v51  ;;  %1402 = vmatpush3.bf16.msra.mxu0 %v1399_v8 }
  0x32   : > { %1404 = vmatprep.subr.bf16.mxu0 %v1647_v11 }
  0x34   : > { %1201 = vmatmul.mubr.f32.gmra.mrb[6].mxu0 %v289_v52 }
  0x35   : > { %1203 = vmatprep.mubr.f32.mxu0 %v290_v53  ;;  %1406 = vmatpush3.bf16.msra.mxu0 %v1647_v11 }
  0x36   : > { %1408 = vmatprep.subr.bf16.mxu0 %v1656_v14 }
  0x38   : > { %1204 = vmatmul.mubr.f32.gmra.mrb[8].mxu0 %v291_v54 }
  0x39   : > { %1206 = vmatprep.mubr.f32.mxu0 %v292_v55  ;;  %1410 = vmatpush3.bf16.msra.mxu0 %v1656_v14 }
  0x3a   : > { %1412 = vmatprep.subr.bf16.mxu0 %v1666_v17 }
  0x3c   : > { %1207 = vmatmul.mubr.f32.gmra.mrb[10].mxu0 %v293_v56 }
  0x3d   : > { %1209 = vmatprep.mubr.f32.mxu0 %v294_v57  ;;  %1414 = vmatpush3.bf16.msra.mxu0 %v1666_v17 }
  0x3e   : > { %1416 = vmatprep.subr.bf16.mxu0 %v1676_v20 }
  0x40   : > { %1210 = vmatmul.mubr.f32.gmra.mrb[12].mxu0 %v295_v58 }
  0x41   : > { %1212 = vmatprep.mubr.f32.mxu0 %v296_v59  ;;  %1418 = vmatpush3.bf16.msra.mxu0 %v1676_v20 }
  0x44   : > { %1213 = vmatmul.mubr.f32.gmra.mrb[14].mxu0 %v297_v60 }
  0xfb   : > { %v1193_v22 = vpop.f32.mrb[0].mxu0 }
  0xfc   : > { %v393_v23 = vadd.f32 %v1193_v22, %v1684_v21  ;;  %v387_v24 = vpop.f32.mrb[1].mxu0 }
  0xfd   : > { %v388_v25 = vadd.f32 %v1684_v21, %v387_v24 }
  0xfe   : > { %v467_v28 = vmax.f32 %v393_v23, 0.0 }
  0xff   : > { %v1196_v26 = vpop.f32.mrb[2].mxu0  ;;  %v466_v27 = vmax.f32 %v388_v25, 0.0 }
 0x100   : > { %v403_v29 = vadd.f32 %v1196_v26, %v1684_v21  ;;  %v397_v30 = vpop.f32.mrb[3].mxu0 }
 0x101   : > { %v398_v31 = vadd.f32 %v1684_v21, %v397_v30  ;;  %1247 = vmatprep.mubr.f32.mxu1 %v466_v27 }
 0x102   : > { %1248 = vmatmul.mubr.f32.vlgmr.msra.gmra.mrb[0].mxu1 %v467_v28  ;;  %v469_v34 = vmax.f32 %v403_v29, 0.0 }
 0x103   : > { %v468_v32 = vmax.f32 %v398_v31, 0.0  ;;  %v1199_v33 = vpop.f32.mrb[4].mxu0  ;;  %1431 = vmatpush3.bf16.msra.mxu1 %v1391_v3 }
 0x104   : > { %v413_v35 = vadd.f32 %v1199_v33, %v1684_v21  ;;  %v407_v36 = vpop.f32.mrb[5].mxu0  ;;  %1424 = vmatprep.subr.bf16.mxu1 %v1395_v5 }
 0x105   : > { %v408_v37 = vadd.f32 %v1684_v21, %v407_v36  ;;  %1250 = vmatprep.mubr.f32.mxu1 %v468_v32 }
 0x106   : > { %1251 = vmatmul.mubr.f32.gmra.mrb[2].mxu1 %v469_v34  ;;  %v471_v40 = vmax.f32 %v413_v35, 0.0 }
 0x107   : > { %v470_v38 = vmax.f32 %v408_v37, 0.0  ;;  %v1202_v39 = vpop.f32.mrb[6].mxu0  ;;  %1432 = vmatpush3.bf16.msra.mxu1 %v1395_v5 }
 0x108   : > { %v423_v41 = vadd.f32 %v1202_v39, %v1684_v21  ;;  %v417_v42 = vpop.f32.mrb[7].mxu0  ;;  %1425 = vmatprep.subr.bf16.mxu1 %v1399_v8 }
 0x109   : > { %v418_v43 = vadd.f32 %v1684_v21, %v417_v42  ;;  %1253 = vmatprep.mubr.f32.mxu1 %v470_v38 }
 0x10a   : > { %1254 = vmatmul.mubr.f32.gmra.mrb[4].mxu1 %v471_v40  ;;  %v473_v46 = vmax.f32 %v423_v41, 0.0 }
 0x10b   : > { %v472_v44 = vmax.f32 %v418_v43, 0.0  ;;  %v1205_v45 = vpop.f32.mrb[8].mxu0  ;;  %1433 = vmatpush3.bf16.msra.mxu1 %v1399_v8  ;;  %v1419_v8 = vpack.c.bf16 %v681_v7, %v680_v6 }
 0x10c   : > { %v433_v47 = vadd.f32 %v1205_v45, %v1684_v21  ;;  %v427_v48 = vpop.f32.mrb[9].mxu0  ;;  %1426 = vmatprep.subr.bf16.mxu1 %v1647_v11 }
 0x10d   : > { %v428_v49 = vadd.f32 %v1684_v21, %v427_v48  ;;  %1256 = vmatprep.mubr.f32.mxu1 %v472_v44  ;;  %1420 = vmatprep.subr.bf16.mxu0 %v1419_v8 }
 0x10e   : > { %1257 = vmatmul.mubr.f32.gmra.mrb[6].mxu1 %v473_v46  ;;  %v475_v52 = vmax.f32 %v433_v47, 0.0  ;;  %1422 = vmatpush3.bf16.msra.mxu0 %v1419_v8 }
 0x10f   : > { %v474_v50 = vmax.f32 %v428_v49, 0.0  ;;  %v1208_v51 = vpop.f32.mrb[10].mxu0  ;;  %1434 = vmatpush3.bf16.msra.mxu1 %v1647_v11 }
 0x110   : > { %v443_v53 = vadd.f32 %v1208_v51, %v1684_v21  ;;  %v437_v54 = vpop.f32.mrb[11].mxu0  ;;  %1427 = vmatprep.subr.bf16.mxu1 %v1656_v14 }
 0x111   : > { %v438_v55 = vadd.f32 %v1684_v21, %v437_v54  ;;  %1259 = vmatprep.mubr.f32.mxu1 %v474_v50 }
 0x112   : > { %1260 = vmatmul.mubr.f32.gmra.mrb[8].mxu1 %v475_v52  ;;  %v477_v58 = vmax.f32 %v443_v53, 0.0 }
 0x113   : > { %v476_v56 = vmax.f32 %v438_v55, 0.0  ;;  %v1211_v57 = vpop.f32.mrb[12].mxu0  ;;  %1435 = vmatpush3.bf16.msra.mxu1 %v1656_v14 }
 0x114   : > { %v453_v59 = vadd.f32 %v1211_v57, %v1684_v21  ;;  %v447_v60 = vpop.f32.mrb[13].mxu0  ;;  %1428 = vmatprep.subr.bf16.mxu1 %v1666_v17 }
 0x115   : > { %v448_v61 = vadd.f32 %v1684_v21, %v447_v60  ;;  %1262 = vmatprep.mubr.f32.mxu1 %v476_v56 }
 0x116   : > { %1263 = vmatmul.mubr.f32.gmra.mrb[10].mxu1 %v477_v58  ;;  %v479_v0 = vmax.f32 %v453_v59, 0.0  ;;  %v981_v58 = vld [vmem:[%s1745_s6] ss:$0 sm:$0xff] }
 0x117   : > { %v478_v62 = vmax.f32 %v448_v61, 0.0  ;;  %v1214_v63 = vpop.f32.mrb[14].mxu0  ;;  %1436 = vmatpush3.bf16.msra.mxu1 %v1666_v17 }
 0x118   : > { %v463_v1 = vadd.f32 %v1214_v63, %v1684_v21  ;;  %v457_v2 = vpop.f32.mrb[15].mxu0  ;;  %1429 = vmatprep.subr.bf16.mxu1 %v1676_v20 }
 0x119   : > { %v458_v3 = vadd.f32 %v1684_v21, %v457_v2  ;;  %1265 = vmatprep.mubr.f32.mxu1 %v478_v62 }
 0x11a   : > { %1266 = vmatmul.mubr.f32.gmra.mrb[12].mxu1 %v479_v0  ;;  %v481_v5 = vmax.f32 %v463_v1, 0.0 }
 0x11b   : > { %v480_v4 = vmax.f32 %v458_v3, 0.0  ;;  %1437 = vmatpush3.bf16.msra.mxu1 %v1676_v20 }
 0x11c   : > { %1430 = vmatprep.subr.bf16.mxu1 %v1419_v8 }
 0x11d   : > { %1268 = vmatprep.mubr.f32.mxu1 %v480_v4 }
 0x11e   : > { %1269 = vmatmul.mubr.f32.gmra.mrb[14].mxu1 %v481_v5 }
 0x11f   : > { %1438 = vmatpush3.bf16.msra.mxu1 %v1419_v8 }
 0x1d5   : > { %v1249_v10 = vpop.f32.mrb[0].mxu1 }
 0x1d6   : > { %v577_v11 = vadd.f32 %v1249_v10, %v980_v9  ;;  %v571_v12 = vpop.f32.mrb[1].mxu1 }
 0x1d7   : > { %v572_v13 = vadd.f32 %v980_v9, %v571_v12 }
 0x1d8   : > { %v651_v16 = vmax.f32 %v577_v11, 0.0 }
 0x1d9   : > { %v650_v14 = vmax.f32 %v572_v13, 0.0  ;;  %v1252_v15 = vpop.f32.mrb[2].mxu1 }
 0x1da   : > { %v587_v17 = vadd.f32 %v1252_v15, %v980_v9  ;;  %v581_v18 = vpop.f32.mrb[3].mxu1 }
 0x1db   : > { %v582_v19 = vadd.f32 %v980_v9, %v581_v18  ;;  %1303 = vmatprep.mubr.f32.mxu0 %v650_v14 }
 0x1dc   : > { %1304 = vmatmul.mubr.f32.vlgmr.msra.gmra.mrb[16].mxu0 %v651_v16  ;;  %v653_v22 = vmax.f32 %v587_v17, 0.0 }
 0x1dd   : > { %v652_v20 = vmax.f32 %v582_v19, 0.0  ;;  %v1255_v21 = vpop.f32.mrb[4].mxu1 }
 0x1de   : > { %v597_v23 = vadd.f32 %v1255_v21, %v980_v9  ;;  %v591_v24 = vpop.f32.mrb[5].mxu1 }
 0x1df   : > { %v592_v25 = vadd.f32 %v980_v9, %v591_v24  ;;  %1306 = vmatprep.mubr.f32.mxu0 %v652_v20 }
 0x1e0   : > { %1307 = vmatmul.mubr.f32.gmra.mrb[18].mxu0 %v653_v22  ;;  %v655_v28 = vmax.f32 %v597_v23, 0.0 }
 0x1e1   : > { %v654_v26 = vmax.f32 %v592_v25, 0.0  ;;  %v1258_v27 = vpop.f32.mrb[6].mxu1 }
 0x1e2   : > { %v607_v29 = vadd.f32 %v1258_v27, %v980_v9  ;;  %v601_v30 = vpop.f32.mrb[7].mxu1 }
 0x1e3   : > { %v602_v31 = vadd.f32 %v980_v9, %v601_v30  ;;  %1309 = vmatprep.mubr.f32.mxu0 %v654_v26 }
 0x1e4   : > { %1310 = vmatmul.mubr.f32.gmra.mrb[20].mxu0 %v655_v28  ;;  %v657_v34 = vmax.f32 %v607_v29, 0.0 }
 0x1e5   : > { %v656_v32 = vmax.f32 %v602_v31, 0.0  ;;  %v1261_v33 = vpop.f32.mrb[8].mxu1 }
 0x1e6   : > { %v617_v35 = vadd.f32 %v1261_v33, %v980_v9  ;;  %v611_v36 = vpop.f32.mrb[9].mxu1 }
 0x1e7   : > { %v612_v37 = vadd.f32 %v980_v9, %v611_v36  ;;  %1312 = vmatprep.mubr.f32.mxu0 %v656_v32 }
 0x1e8   : > { %1313 = vmatmul.mubr.f32.gmra.mrb[22].mxu0 %v657_v34  ;;  %v659_v40 = vmax.f32 %v617_v35, 0.0 }
 0x1e9   : > { %v658_v38 = vmax.f32 %v612_v37, 0.0  ;;  %v1264_v39 = vpop.f32.mrb[10].mxu1 }
 0x1ea   : > { %v627_v41 = vadd.f32 %v1264_v39, %v980_v9  ;;  %v621_v42 = vpop.f32.mrb[11].mxu1 }
 0x1eb   : > { %v622_v43 = vadd.f32 %v980_v9, %v621_v42  ;;  %1315 = vmatprep.mubr.f32.mxu1 %v658_v38 }
 0x1ec   : > { %1316 = vmatmul.mubr.f32.vlgmr.msra.gmra.mrb[16].mxu1 %v659_v40  ;;  %v661_v46 = vmax.f32 %v627_v41, 0.0 }
 0x1ed   : > { %v660_v44 = vmax.f32 %v622_v43, 0.0  ;;  %v1267_v45 = vpop.f32.mrb[12].mxu1 }
 0x1ee   : > { %v637_v47 = vadd.f32 %v1267_v45, %v980_v9  ;;  %v631_v48 = vpop.f32.mrb[13].mxu1 }
 0x1ef   : > { %v632_v49 = vadd.f32 %v980_v9, %v631_v48  ;;  %1318 = vmatprep.mubr.f32.mxu1 %v660_v44 }
 0x1f0   : > { %1319 = vmatmul.mubr.f32.gmra.mrb[18].mxu1 %v661_v46  ;;  %v663_v52 = vmax.f32 %v637_v47, 0.0 }
 0x1f1   : > { %v662_v50 = vmax.f32 %v632_v49, 0.0  ;;  %v1270_v51 = vpop.f32.mrb[14].mxu1 }
 0x1f2   : > { %v647_v53 = vadd.f32 %v1270_v51, %v980_v9  ;;  %v641_v54 = vpop.f32.mrb[15].mxu1 }
 0x1f3   : > { %v642_v55 = vadd.f32 %v980_v9, %v641_v54  ;;  %1321 = vmatprep.mubr.f32.mxu1 %v662_v50 }
 0x1f4   : > { %1322 = vmatmul.mubr.f32.gmra.mrb[20].mxu1 %v663_v52  ;;  %v665_v57 = vmax.f32 %v647_v53, 0.0 }
 0x1f5   : > { %v664_v56 = vmax.f32 %v642_v55, 0.0 }
 0x1f7   : > { %1324 = vmatprep.mubr.f32.mxu1 %v664_v56 }
 0x1f8   : > { %1325 = vmatmul.mubr.f32.gmra.mrb[22].mxu1 %v665_v57 }
 0x2af   : > { %v1305_v59 = vpop.f32.mrb[16].mxu0 }
 0x2b0   : > { %v761_v60 = vadd.f32 %v1305_v59, %v981_v58  ;;  %v755_v61 = vpop.f32.mrb[17].mxu0 }
 0x2b1   : > { %v756_v62 = vadd.f32 %v981_v58, %v755_v61 }
 0x2b3   : > { %v1019_v63 = vpack.c.bf16 %v761_v60, %v756_v62  ;;  %v1308_v0 = vpop.f32.mrb[18].mxu0 }
 0x2b4   : > { %v771_v1 = vadd.f32 %v1308_v0, %v981_v58  ;;  %v765_v2 = vpop.f32.mrb[19].mxu0 }
 0x2b5   : > { %1020 = vst [vmem:[%s1726_s10] sm:$0xff] %v1019_v63   ;;  %v766_v3 = vadd.f32 %v981_v58, %v765_v2 }
 0x2b7   : > { %v1024_v4 = vpack.c.bf16 %v771_v1, %v766_v3  ;;  %v1311_v5 = vpop.f32.mrb[20].mxu0 }
 0x2b8   : > { %v781_v6 = vadd.f32 %v1311_v5, %v981_v58  ;;  %v775_v7 = vpop.f32.mrb[21].mxu0 }
 0x2b9   : > { %1056 = vst [vmem:[%s1726_s10 + $0x8] sm:$0xff] %v1024_v4   ;;  %v776_v8 = vadd.f32 %v981_v58, %v775_v7 }
 0x2bb   : > { %v1029_v9 = vpack.c.bf16 %v781_v6, %v776_v8  ;;  %v1314_v10 = vpop.f32.mrb[22].mxu0 }
 0x2bc   : > { %v791_v11 = vadd.f32 %v1314_v10, %v981_v58  ;;  %v785_v12 = vpop.f32.mrb[23].mxu0 }
 0x2bd   : > { %1057 = vst [vmem:[%s1726_s10 + $0x10] sm:$0xff] %v1029_v9   ;;  %v786_v13 = vadd.f32 %v981_v58, %v785_v12 }
 0x2bf   : > { %v1034_v14 = vpack.c.bf16 %v791_v11, %v786_v13  ;;  %v1317_v15 = vpop.f32.mrb[16].mxu1 }
 0x2c0   : > { %v801_v16 = vadd.f32 %v1317_v15, %v981_v58  ;;  %v795_v17 = vpop.f32.mrb[17].mxu1 }
 0x2c1   : > { %1058 = vst [vmem:[%s1726_s10 + $0x18] sm:$0xff] %v1034_v14   ;;  %v796_v18 = vadd.f32 %v981_v58, %v795_v17 }
 0x2c3   : > { %v1039_v19 = vpack.c.bf16 %v801_v16, %v796_v18  ;;  %v1320_v20 = vpop.f32.mrb[18].mxu1 }
 0x2c4   : > { %v811_v21 = vadd.f32 %v1320_v20, %v981_v58  ;;  %v805_v22 = vpop.f32.mrb[19].mxu1 }
 0x2c5   : > { %1059 = vst [vmem:[%s1726_s10 + $0x20] sm:$0xff] %v1039_v19   ;;  %v806_v23 = vadd.f32 %v981_v58, %v805_v22 }
 0x2c7   : > { %v1044_v24 = vpack.c.bf16 %v811_v21, %v806_v23  ;;  %v1323_v25 = vpop.f32.mrb[20].mxu1 }
 0x2c8   : > { %v821_v26 = vadd.f32 %v1323_v25, %v981_v58  ;;  %v815_v27 = vpop.f32.mrb[21].mxu1 }
 0x2c9   : > { %1060 = vst [vmem:[%s1726_s10 + $0x28] sm:$0xff] %v1044_v24   ;;  %v816_v28 = vadd.f32 %v981_v58, %v815_v27 }
 0x2cb   : > { %v1049_v29 = vpack.c.bf16 %v821_v26, %v816_v28  ;;  %v1326_v30 = vpop.f32.mrb[22].mxu1 }
 0x2cc   : > { %v831_v31 = vadd.f32 %v1326_v30, %v981_v58  ;;  %v825_v32 = vpop.f32.mrb[23].mxu1 }
 0x2cd   : > { %1061 = vst [vmem:[%s1726_s10 + $0x30] sm:$0xff] %v1049_v29   ;;  %v826_v33 = vadd.f32 %v981_v58, %v825_v32 }
 0x2cf   : > { %v1054_v34 = vpack.c.bf16 %v831_v31, %v826_v33 }
 0x2d1   : > { %1062 = vst [vmem:[%s1726_s10 + $0x38] sm:$0xff] %v1054_v34  }
 0x2d2 PF: > { %s17_s24 = sadd.s32 1, %s1453_s24  }
 0x2d3   : > { %p14_p4 = scmp.ge.s32.totalorder %s17_s24, 4  }
 0x2d5   :  { %16 = sbr.rel (!%p14_p4) target bundleno = 1 (0x1), region = 78 }

</bundles_post_ra>
